<compile_context>
chip_gen: v5e
topology: v5e:2x2
jax: 0.10.0
libtpu: 0.0.40
codegen_flags: <defaults>
</compile_context>

<pallas_src>
import jax
import jax.numpy as jnp
from jax import lax
from jax.experimental import pallas as pl
from jax.experimental.pallas import tpu as pltpu


def _round_up(n, m):
    return ((n + m - 1) // m) * m


def embed_to_latents_kernel(x_ref, w_ref, o_ref):
    # x_ref: (tm, dim_pad), w_ref: (dim_pad, dl_pad) -- K-major weight, resident block.
    latents = jnp.dot(x_ref[...], w_ref[...], preferred_element_type=jnp.float32)
    # L2 normalize along last dim: v / max(||v||, 1e-12)  (torch F.normalize semantics).
    # rsqrt(max(sq, eps^2)) == 1 / max(||v||, eps); rsqrt goes to the EUP slot.
    sq = jnp.sum(latents * latents, axis=-1, keepdims=True)
    inv_norm = lax.rsqrt(jnp.maximum(sq, 1e-24))
    o_ref[...] = (latents * inv_norm).astype(o_ref.dtype)


def embed_to_latents(x, weight, *, tm=None, compute_dtype=jnp.bfloat16):
    """x: [..., dim]; weight: [dim_latents, dim] (PyTorch nn.Linear layout, no bias).

    compute_dtype: dtype for the MXU inputs (default bf16); accumulation and the
    normalization epilogue are always f32. Pass jnp.float32 (or None) for exact math.
    """
    orig_shape = x.shape
    dim = orig_shape[-1]
    dim_latents = weight.shape[0]
    out_dtype = x.dtype

    x2d = x.reshape(-1, dim)
    M = x2d.shape[0]

    # Hardware-dependent knobs (VMEM limit, M tile); fall back conservatively.
    try:
        phys_vmem = int(pltpu.get_tpu_info().vmem_capacity_bytes)
    except Exception:
        phys_vmem = 64 * 1024 * 1024
    vmem_limit = int(min(phys_vmem // 2, 100 * 1024 * 1024))
    if tm is None:
        tm = 256 if phys_vmem <= 64 * 1024 * 1024 else 512  # v7x vs v5e/v6e

    # N padding: lane-dense stores; 256-aligned for the v6e/v7x 256-wide MXU.
    n_align = 256 if dim_latents >= 256 else 128
    dl_pad = _round_up(max(dim_latents, 128), n_align)

    # One-time K-major weight [dim_pad, dl_pad]; pad K only when not lane-dense.
    dim_pad = _round_up(dim, 128)
    w_t = weight.T  # [dim, dim_latents]
    if (dim_pad != dim) or (dl_pad != dim_latents):
        w_t = jnp.pad(w_t, ((0, dim_pad - dim), (0, dl_pad - dim_latents)))
    if dim_pad != dim:
        # K-only padding of x (rare for real model dims); M is never padded.
        x2d = jnp.pad(x2d, ((0, 0), (0, dim_pad - dim)))

    if compute_dtype is not None:
        if x2d.dtype != compute_dtype:
            x2d = x2d.astype(compute_dtype)
        if w_t.dtype != compute_dtype:
            w_t = w_t.astype(compute_dtype)

    # Sublane packing of the compute dtype: 8 (4-byte), 16 (bf16), 32 (int8/fp8).
    itemsize = jnp.dtype(x2d.dtype).itemsize
    sub = {4: 8, 2: 16, 1: 32}.get(itemsize, 8)

    tm_eff = _round_up(min(tm, _round_up(M, sub)), sub)
    # Prefer >= 2 grid steps when possible so the parallel M axis uses both v7x cores.
    if pl.cdiv(M, tm_eff) < 2 and M >= 2 * sub:
        tm_eff = _round_up(pl.cdiv(M, 2), sub)

    grid = (pl.cdiv(M, tm_eff),)

    cost = pl.CostEstimate(
        flops=2 * M * dim_pad * dl_pad,
        transcendentals=M,  # one rsqrt per output row
        bytes_accessed=(
            x2d.size * x2d.dtype.itemsize
            + w_t.size * w_t.dtype.itemsize
            + M * dl_pad * jnp.dtype(out_dtype).itemsize
        ),
    )

    # TODO(synk): for very large (dim_pad x dl_pad) weights (v7x's 64 MiB VMEM), add a
    # K grid axis ("arbitrary") with an f32 accumulator scratch (normalize only on the
    # last K step) and mark the resident weight block pipeline_mode=pl.Buffered(1).
    out = pl.pallas_call(
        embed_to_latents_kernel,
        out_shape=jax.ShapeDtypeStruct((M, dl_pad), out_dtype),
        grid_spec=pltpu.PrefetchScalarGridSpec(
            num_scalar_prefetch=0,
            grid=grid,
            in_specs=[
                pl.BlockSpec((tm_eff, dim_pad), lambda i: (i, 0)),
                # Constant block index -> weight stays resident across the grid.
                pl.BlockSpec((dim_pad, dl_pad), lambda i: (0, 0)),
            ],
            out_specs=pl.BlockSpec((tm_eff, dl_pad), lambda i: (i, 0)),
        ),
        compiler_params=pltpu.CompilerParams(
            dimension_semantics=("parallel",),  # shards M across TCs on v7x
            vmem_limit_bytes=vmem_limit,
        ),
        cost_estimate=cost,
    )(x2d, w_t)

    if dl_pad != dim_latents:
        out = out[:, :dim_latents]
    return out.reshape(*orig_shape[:-1], dim_latents)


if __name__ == "__main__":
    key = jax.random.PRNGKey(0)
    batch, seq, dim, dim_latents = 2, 8, 32, 64

    kx, kw = jax.random.split(key)
    x = jax.random.normal(kx, (batch, seq, dim), dtype=jnp.float32)
    # nn.Linear(dim, dim_latents, bias=False).weight has shape [dim_latents, dim]
    weight = jax.random.normal(kw, (dim_latents, dim), dtype=jnp.float32) * (
        1.0 / jnp.sqrt(dim)
    )

    # Reference in plain JAX (torch F.normalize semantics).
    ref = x @ weight.T
    ref = ref / jnp.maximum(jnp.linalg.norm(ref, axis=-1, keepdims=True), 1e-12)

    # Default path: bf16 MXU inputs, f32 accumulation/normalization (loose tolerance).
    out_bf16 = jax.block_until_ready(embed_to_latents(x, weight))
    assert out_bf16.shape == (batch, seq, dim_latents)
    assert out_bf16.dtype == x.dtype
    assert jnp.allclose(out_bf16, ref, atol=3e-2, rtol=3e-2)

    # Exact path: f32 MXU inputs (tight tolerance).
    out_f32 = jax.block_until_ready(
        embed_to_latents(x, weight, compute_dtype=jnp.float32)
    )
    assert out_f32.shape == (batch, seq, dim_latents)
    assert jnp.allclose(out_f32, ref, atol=1e-5, rtol=1e-5)

    print("KERNEL_OK")
</pallas_src>

<mosaic_0001>
module attributes {stable_mosaic.version = 11 : i64} {
  func.func @embed_to_latents_kernel(%arg0: i32, %arg1: memref<16x128xbf16, #tpu.memory_space<vmem>>, %arg2: memref<128x128xbf16, #tpu.memory_space<vmem>>, %arg3: memref<16x128xf32, #tpu.memory_space<vmem>>) attributes {dimension_semantics = [#tpu.dimension_semantics<parallel>], iteration_bounds = array<i64: 1>, scalar_prefetch = 0 : i64, scratch_operands = 0 : i64, tpu.core_type = #tpu.core_type<tc>, window_params = [{transform_indices = @transform_0, window_bounds = array<i64: 16, 128>}, {pipeline_mode = #tpu.pipeline_mode<synchronous>, transform_indices = @transform_1, window_bounds = array<i64: 128, 128>}, {transform_indices = @transform_2, window_bounds = array<i64: 16, 128>}]} {
    %c0 = arith.constant 0 : index
    %c0_0 = arith.constant 0 : index
    %0 = vector.load %arg1[%c0, %c0_0] : memref<16x128xbf16, #tpu.memory_space<vmem>>, vector<16x128xbf16>
    %c0_1 = arith.constant 0 : index
    %c0_2 = arith.constant 0 : index
    %1 = vector.load %arg2[%c0_1, %c0_2] : memref<128x128xbf16, #tpu.memory_space<vmem>>, vector<128x128xbf16>
    %cst = arith.constant dense<0.000000e+00> : vector<16x128xf32>
    %2 = tpu.matmul %0, %1, %cst {dimension_numbers = #tpu.dot_dimension_numbers<[1], [0], [0], [1], [0, 0, 1, 1], [], []>} : vector<16x128xbf16>, vector<128x128xbf16>, vector<16x128xf32> -> vector<16x128xf32>
    %3 = arith.mulf %2, %2 : vector<16x128xf32>
    %cst_3 = arith.constant dense<0.000000e+00> : vector<16xf32>
    %4 = vector.multi_reduction <add>, %3, %cst_3 [1] : vector<16x128xf32> to vector<16xf32>
    %5 = vector.shape_cast %4 : vector<16xf32> to vector<16x1xf32>
    %cst_4 = arith.constant 1.000000e-24 : f32
    %6 = vector.broadcast %cst_4 : f32 to vector<16x1xf32>
    %7 = arith.maximumf %5, %6 : vector<16x1xf32>
    %8 = math.rsqrt %7 : vector<16x1xf32>
    %9 = vector.broadcast %8 : vector<16x1xf32> to vector<16x128xf32>
    %10 = arith.mulf %2, %9 : vector<16x128xf32>
    %c0_5 = arith.constant 0 : index
    %c0_6 = arith.constant 0 : index
    %11 = vector.load %arg3[%c0_5, %c0_6] : memref<16x128xf32, #tpu.memory_space<vmem>>, vector<16x128xf32>
    tpu.vector_store %arg3[%c0_5, %c0_6], %10 {strides = array<i32>} : memref<16x128xf32, #tpu.memory_space<vmem>>, vector<16x128xf32>,
    return
  }
  func.func @transform_0(%arg0: i32) -> (i32, i32) {
    %c0_i32 = arith.constant 0 : i32
    %c0_i32_0 = arith.constant 0 : i32
    return %arg0, %c0_i32 : i32, i32
  }
  func.func @transform_1(%arg0: i32) -> (i32, i32) {
    %c0_i32 = arith.constant 0 : i32
    %c0_i32_0 = arith.constant 0 : i32
    %c0_i32_1 = arith.constant 0 : i32
    return %c0_i32, %c0_i32_0 : i32, i32
  }
  func.func @transform_2(%arg0: i32) -> (i32, i32) {
    %c0_i32 = arith.constant 0 : i32
    %c0_i32_0 = arith.constant 0 : i32
    return %arg0, %c0_i32 : i32, i32
  }
}

</mosaic_0001>

<bundles_post_ra>
// kernel: tpu_custom_call.1
= control target key start
LH: loop header
LB: loop body
LE: loop exit
PB: predicated region body
PF: predicated region fallthrough
CT: control target
= control target key end

     0   :  { %7 = vsyncpa [#allocation3], 0  ;;  %s347_s0 = inlined_call_operand.hbm [shape: bf16[16,128], index: 0, kind: input, shape index: {}]   ;;  %s348_s1 = inlined_call_operand.hbm [shape: bf16[128,128], index: 1, kind: input, shape index: {}]   ;;  %s349_s2 = inlined_call_operand.hbm [shape: f32[16,128], index: 2, kind: output, shape index: {}]  }
   0x1   :  { %8 = vsyncpa [#allocation6], 0 }
   0x2   :  { %9 = vsyncpa [#allocation4], 0  ;;  %s14_s11 = sshll.u32 %s347_s0, 4  ;;  %s316_s12 = smov [#allocation2]   ;;  %s15_s11 = int_to_ptr.hbm [resolvable:$true] %s14_s11 }
   0x3   :  { %s16_s13 = sshll.u32 %s316_s12, 4  ;;  %s27_s16 = sshll.u32 %s348_s1, 4  ;;  %s17_s13 = int_to_ptr.vmem [resolvable:$true] %s16_s13  ;;  %s28_s16 = int_to_ptr.hbm [resolvable:$true] %s27_s16 }
   0x4   :  { %s317_s17 = smov 64   ;;  %s318_s18 = smov 4  }
   0x5   :  { %22 = dma.hbm_to_vmem [thread:$0]  %s15_s11, 128, %s17_s13, [#allocation3], %s317_s17, %s317_s17, %s318_s18  }
   0x6   :  { %s319_s19 = smov [#allocation5]  }
   0x7   :  { %s29_s20 = sshll.u32 %s319_s19, 4  ;;  %s30_s20 = int_to_ptr.vmem [resolvable:$true] %s29_s20 }
   0x8   :  { %35 = dma.hbm_to_vmem [thread:$0]  %s28_s16, 1024, %s30_s20, [#allocation6], %s317_s17, %s317_s17, %s318_s18  }
   0x9   :  { %310 = dma.done.wait [#allocation3], 128  }
   0xa   :  { %311 = vsyncadd [#allocation3], 4294967168 }
   0xb   :  { %312 = dma.done.wait [#allocation6], 1024  }
   0xc   :  { %313 = vsyncadd [#allocation6], 4294966272  ;;  %v226_v0 = vld [vmem:[#allocation5 + $0x38] sm:$0xff]  ;;  %v225_v1 = vld [vmem:[#allocation5 + $0x30] sm:$0xff]  ;;  %s320_s0 = smov [#allocation7]   ;;  %s168_s23 = sshll.u32 %s349_s2, 4  ;;  %s169_s23 = int_to_ptr.hbm [resolvable:$true] %s168_s23 }
   0xd   :  { %116 = vmatpush.bf16.msra.mxu0 %v226_v0  ;;  %v224_v2 = vld [vmem:[#allocation5 + $0x28] sm:$0xff]  ;;  %v223_v3 = vld [vmem:[#allocation5 + $0x20] sm:$0xff]  ;;  %v222_v4 = vld [vmem:[#allocation5 + $0x18] sm:$0xff]  ;;  %s166_s1 = sshll.u32 %s320_s0, 4  ;;  %s321_s24 = smov 128   ;;  %s167_s1 = int_to_ptr.vmem [resolvable:$true] %s166_s1 }
   0xe   :  { %v221_v5 = vld [vmem:[#allocation5 + $0x10] sm:$0xff]  ;;  %v220_v6 = vld [vmem:[#allocation5 + $0x8] sm:$0xff]  ;;  %v219_v7 = vld [vmem:[#allocation5] sm:$0xff]  ;;  %s322_s25 = smov 8  }
   0xf   :  { %v218_v8 = vld [vmem:[#allocation2] sm:$0xff] }
  0x11   :  { %117 = vmatpush.bf16.msra.mxu0 %v225_v1 }
  0x15   :  { %118 = vmatpush.bf16.msra.mxu0 %v224_v2 }
  0x19   :  { %119 = vmatpush.bf16.msra.mxu0 %v223_v3 }
  0x1d   :  { %120 = vmatpush.bf16.msra.mxu0 %v222_v4 }
  0x21   :  { %121 = vmatpush.bf16.msra.mxu0 %v221_v5 }
  0x25   :  { %122 = vmatpush.bf16.msra.mxu0 %v220_v6 }
  0x29   :  { %123 = vmatpush.bf16.msra.mxu0 %v219_v7 }
  0x2c   :  { %124 = vmatmul.bf16.vlgmr.msra.gmra.mxu0 %v218_v8 }
  0xa9   :  { %v125_v9 = vpop.f32.mrf.mxu0 }
  0xaa   :  { %v130_v10 = vmul.f32 %v125_v9, %v125_v9 }
  0xac   :  { %132 = vadd.xlane.f32.xlu0 %v130_v10 }
  0xb1   :  { %v127_v11 = vpop.f32.mrf.mxu0 }
  0xb2   :  { %v131_v12 = vmul.f32 %v127_v11, %v127_v11 }
  0xb4   :  { %134 = vadd.xlane.f32.xlu0 %v131_v12 }
 0x11f   :  { %v133_v13 = vpop.xlane.xlu0 %132 }
 0x120   :  { %v136_v14 = vmax.f32 %v133_v13, 1e-24 }
 0x122   :  { %234 = vrsqrt.f32 %v136_v14  ;;  %vm144_vm1 = vweird.f32 %v136_v14 }
 0x127   :  { %v135_v15 = vpop.xlane.xlu0 %134 }
 0x128   :  { %v235_v16 = vpop.eup %234  ;;  %v137_v17 = vmax.f32 %v135_v15, 1e-24 }
 0x129   :  { %v139_v18 = vmul.f32 %v235_v16, %v136_v14  ;;  %vm145_vm0 = vweird.f32 %v235_v16 }
 0x12a   :  { %236 = vrsqrt.f32 %v137_v17  ;;  %vm146_vm2 = vmor %vm144_vm1, %vm145_vm0  ;;  %vm154_vm4 = vweird.f32 %v137_v17 }
 0x12b   :  { %v140_v19 = vmul.f32 %v235_v16, %v139_v18 }
 0x12d   :  { %v141_v20 = vmul.f32 0.5, %v140_v19 }
 0x12f   :  { %v142_v21 = vsub.f32 1.5, %v141_v20 }
 0x130   :  { %v237_v22 = vpop.eup %236 }
 0x131   :  { %v143_v23 = vmul.f32 %v235_v16, %v142_v21  ;;  %v149_v24 = vmul.f32 %v237_v22, %v137_v17  ;;  %vm155_vm3 = vweird.f32 %v237_v22 }
 0x132   :  { %vm156_vm5 = vmor %vm154_vm4, %vm155_vm3 }
 0x133   :  { %v147_v25 = vsel %vm146_vm2, %v235_v16, %v143_v23  ;;  %v150_v26 = vmul.f32 %v237_v22, %v149_v24 }
 0x134   :  { %v158_v27 = vmul.f32 %v147_v25, %v125_v9 }
 0x135   :  { %v151_v28 = vmul.f32 0.5, %v150_v26 }
 0x136   :  { %160 = vst [vmem:[#allocation7] sm:$0xff] %v158_v27 }
 0x137   :  { %v152_v29 = vsub.f32 1.5, %v151_v28 }
 0x139   :  { %v153_v30 = vmul.f32 %v237_v22, %v152_v29 }
 0x13b   :  { %v157_v31 = vsel %vm156_vm5, %v237_v22, %v153_v30 }
 0x13c   :  { %v159_v32 = vmul.f32 %v157_v31, %v127_v11 }
 0x13e   :  { %161 = vst [vmem:[#allocation7 + $0x8] sm:$0xff] %v159_v32 }
 0x13f   :  { %174 = dma.vmem_to_hbm [thread:$0]  %s167_s1, 256, %s169_s23, [#allocation4], %s321_s24, %s321_s24, %s322_s25  }
 0x140   :  { %314 = dma.done.wait [#allocation4], 256  }
 0x141   :  { %315 = vsyncadd [#allocation4], 4294967040 }
 0x142   :  { %179 = vsyncpa [#allocation3], 1 }
 0x143   :  { %180 = vsyncpa [#allocation6], 1 }
 0x144   :  { %181 = vsyncpa [#allocation4], 1 }

</bundles_post_ra>
